<compile_context>
chip_gen: v7x
topology: tpu7x:2x2x1
jax: 0.10.0
libtpu: 0.0.40
codegen_flags: <defaults>
</compile_context>

<pallas_src>
import jax
import jax.numpy as jnp
from jax import lax
from jax.experimental import pallas as pl
from jax.experimental.pallas import tpu as pltpu


def _round_up(x, m):
    return ((x + m - 1) // m) * m


def mlp_kernel(x_ref, w_ref, b_ref, o_ref):
    # x_ref: [TM, Hp] ; w_ref: [Hp, Hp] in PyTorch Linear layout (out, in) — NOT transposed.
    # Contract x dim 1 against w dim 1 on the MXU with f32 accumulation.
    y = lax.dot_general(
        x_ref[...], w_ref[...],
        dimension_numbers=(((1,), (1,)), ((), ())),
        preferred_element_type=jnp.float32,
    )
    # Epilogue in f32 on VPU/EUP; cast only at the store.
    y = y + b_ref[...]                       # broadcast [1, Hp] over rows
    o_ref[...] = jnp.tanh(y).astype(o_ref.dtype)


def mlp_layer(features, weight, bias, *, tm=256):
    """tanh(features @ weight.T + bias)

    features: [B, H]; weight: PyTorch nn.Linear weight [H_out, H_in]; bias: [H_out].
    """
    B, H = features.shape
    H_out, H_in = weight.shape
    assert H == H_in and H_out == H_in, "MLPLayer is square (hidden -> hidden)"

    # Lane-dense hidden dim (multiple of 128).
    Hp = _round_up(H, 128)

    # Batch tile: multiple of 8 sublanes; weight stays resident across the grid.
    TM = min(tm, _round_up(B, 8))

    # Keep the (double-buffered x + out, resident weight) footprint well under
    # v7x's 64 MiB physical VMEM.
    def footprint(tm_):
        return (2 * tm_ * Hp + 2 * tm_ * Hp + 2 * Hp * Hp + Hp) * 4
    while TM > 8 and footprint(TM) > 40 * 1024 * 1024:
        TM //= 2
    TM = max(_round_up(TM, 8), 8)
    Bp = _round_up(B, TM)

    # TODO(synk): for production hidden sizes (>= 2048) also tile N/K with an f32
    # VMEM accumulator and feed bf16 inputs (f32 accumulate) for MXU peak.

    dt = features.dtype
    # Zero-pad: padded input columns x padded weight rows contribute 0; padded
    # output columns (bias 0) give tanh(0) = 0 and are sliced off below.
    x_p = jnp.zeros((Bp, Hp), dt).at[:B, :H].set(features)
    w_p = jnp.zeros((Hp, Hp), dt).at[:H, :H].set(weight)      # kept as [H_out, H_in]
    b_p = jnp.zeros((1, Hp), dt).at[0, :H].set(bias)

    out = pl.pallas_call(
        mlp_kernel,
        out_shape=jax.ShapeDtypeStruct((Bp, Hp), dt),
        grid=(Bp // TM,),
        in_specs=[
            pl.BlockSpec((TM, Hp), lambda i: (i, 0)),   # x: pipelined over batch tiles
            pl.BlockSpec((Hp, Hp), lambda i: (0, 0)),   # weight: DMA'd once, stays resident
            pl.BlockSpec((1, Hp), lambda i: (0, 0)),    # bias: resident
        ],
        out_specs=pl.BlockSpec((TM, Hp), lambda i: (i, 0)),
        compiler_params=pltpu.CompilerParams(
            dimension_semantics=("parallel",),          # shard batch over 2 TCs on v7x
            vmem_limit_bytes=min(max(footprint(TM) + (4 << 20), 16 << 20), 60 << 20),
        ),
    )(x_p, w_p, b_p)

    return out[:B, :H]


if __name__ == "__main__":
    key = jax.random.PRNGKey(0)
    k_x, k_w, k_b = jax.random.split(key, 3)

    batch, hidden = 8, 32  # small shapes consistent with [batch, hidden_size] CLS features
    features = jax.random.normal(k_x, (batch, hidden), dtype=jnp.float32)
    # deterministic synthetic parameters (shapes from nn.Linear(hidden, hidden))
    weight = jax.random.normal(k_w, (hidden, hidden), dtype=jnp.float32) * 0.02
    bias = jax.random.normal(k_b, (hidden,), dtype=jnp.float32) * 0.02

    out = mlp_layer(features, weight, bias)
    out = jax.block_until_ready(out)

    # correctness check against pure-JAX reference of the PyTorch forward
    ref = jnp.tanh(features @ weight.T + bias)
    assert out.shape == (batch, hidden)
    assert jnp.allclose(out, ref, atol=1e-5, rtol=1e-5)
    print("KERNEL_OK")
</pallas_src>

<mosaic_0001>
module attributes {stable_mosaic.version = 11 : i64} {
  func.func @mlp_kernel(%arg0: i32, %arg1: memref<8x128xf32, #tpu.memory_space<vmem>>, %arg2: memref<128x128xf32, #tpu.memory_space<vmem>>, %arg3: memref<1x128xf32, #tpu.memory_space<vmem>>, %arg4: memref<8x128xf32, #tpu.memory_space<vmem>>) attributes {dimension_semantics = [#tpu.dimension_semantics<parallel>], iteration_bounds = array<i64: 1>, scalar_prefetch = 0 : i64, scratch_operands = 0 : i64, tpu.core_type = #tpu.core_type<tc>, window_params = [{transform_indices = @transform_0, window_bounds = array<i64: 8, 128>}, {pipeline_mode = #tpu.pipeline_mode<synchronous>, transform_indices = @transform_1, window_bounds = array<i64: 128, 128>}, {pipeline_mode = #tpu.pipeline_mode<synchronous>, transform_indices = @transform_2, window_bounds = array<i64: 1, 128>}, {transform_indices = @transform_3, window_bounds = array<i64: 8, 128>}]} {
    %c0 = arith.constant 0 : index
    %c0_0 = arith.constant 0 : index
    %0 = vector.load %arg1[%c0, %c0_0] : memref<8x128xf32, #tpu.memory_space<vmem>>, vector<8x128xf32>
    %c0_1 = arith.constant 0 : index
    %c0_2 = arith.constant 0 : index
    %1 = vector.load %arg2[%c0_1, %c0_2] : memref<128x128xf32, #tpu.memory_space<vmem>>, vector<128x128xf32>
    %cst = arith.constant dense<0.000000e+00> : vector<8x128xf32>
    %2 = tpu.matmul %0, %1, %cst {dimension_numbers = #tpu.dot_dimension_numbers<[1], [1], [0], [0], [0, 0, 1, 0], [], []>} : vector<8x128xf32>, vector<128x128xf32>, vector<8x128xf32> -> vector<8x128xf32>
    %c0_3 = arith.constant 0 : index
    %c0_4 = arith.constant 0 : index
    %3 = vector.load %arg3[%c0_3, %c0_4] : memref<1x128xf32, #tpu.memory_space<vmem>>, vector<1x128xf32>
    %4 = vector.broadcast %3 : vector<1x128xf32> to vector<8x128xf32>
    %5 = arith.addf %2, %4 : vector<8x128xf32>
    %6 = math.tanh %5 : vector<8x128xf32>
    %c0_5 = arith.constant 0 : index
    %c0_6 = arith.constant 0 : index
    %7 = vector.load %arg4[%c0_5, %c0_6] : memref<8x128xf32, #tpu.memory_space<vmem>>, vector<8x128xf32>
    tpu.vector_store %arg4[%c0_5, %c0_6], %6 {strides = array<i32>} : memref<8x128xf32, #tpu.memory_space<vmem>>, vector<8x128xf32>,
    return
  }
  func.func @transform_0(%arg0: i32) -> (i32, i32) {
    %c0_i32 = arith.constant 0 : i32
    %c0_i32_0 = arith.constant 0 : i32
    return %arg0, %c0_i32 : i32, i32
  }
  func.func @transform_1(%arg0: i32) -> (i32, i32) {
    %c0_i32 = arith.constant 0 : i32
    %c0_i32_0 = arith.constant 0 : i32
    %c0_i32_1 = arith.constant 0 : i32
    return %c0_i32, %c0_i32_0 : i32, i32
  }
  func.func @transform_2(%arg0: i32) -> (i32, i32) {
    %c0_i32 = arith.constant 0 : i32
    %c0_i32_0 = arith.constant 0 : i32
    %c0_i32_1 = arith.constant 0 : i32
    return %c0_i32, %c0_i32_0 : i32, i32
  }
  func.func @transform_3(%arg0: i32) -> (i32, i32) {
    %c0_i32 = arith.constant 0 : i32
    %c0_i32_0 = arith.constant 0 : i32
    return %arg0, %c0_i32 : i32, i32
  }
}

</mosaic_0001>

<bundles_post_ra>
// kernel: tpu_custom_call.1
= control target key start
LH: loop header
LB: loop body
LE: loop exit
PB: predicated region body
PF: predicated region fallthrough
CT: control target
= control target key end

     0   :  { %8 = vsyncpa [#allocation3], 0  ;;  %s386_s0 = inlined_call_operand.hbm [shape: f32[8,128], index: 0, kind: input, shape index: {}]   ;;  %s387_s1 = inlined_call_operand.hbm [shape: f32[128,128], index: 1, kind: input, shape index: {}]   ;;  %s388_s2 = inlined_call_operand.vmem [shape: f32[1,128], index: 2, kind: input, shape index: {}]   ;;  %s389_s3 = inlined_call_operand.hbm [shape: f32[8,128], index: 3, kind: output, shape index: {}]  }
   0x1   :  { %9 = vsyncpa [#allocation6], 0 }
   0x2   :  { %10 = vsyncpa [#allocation4], 0  ;;  %s312_s12 = smov [#allocation2]   ;;  %s313_s14 = smov [#allocation5]  }
   0x3   :  { %s17_s13 = sshll.u32 %s312_s12, 4  ;;  %s26_s15 = sshll.u32 %s313_s14, 4  ;;  %s18_s13 = int_to_ptr.vmem [resolvable:$true] %s17_s13  ;;  %s340_s15 = int_to_ptr.vmem [resolvable:$true] %s26_s15 }
   0x4   :  { %s240_s18 = scalar_lea.hbm %s386_s0, 128 }
   0x5   :  { %p241_p0 = scmp.ne.s32.totalorder %s386_s0, %s240_s18  ;;  %p244_p1 = scmp.lt.u32.totalorder %s240_s18, %s386_s0 }
   0x7   :  { %p246_p2 = pnand %p244_p1, %p241_p0 }
   0x9   :  { %249 = shalt.err (!%p246_p2)
}
   0xa   :  { %s250_s23 = scalar_lea.vmem %s18_s13, 128  ;;  %p255_p4 = scmp.lt.s32.totalorder %s18_s13, %s18_s13 }
   0xb   :  { %p251_p3 = scmp.ne.s32.totalorder %s18_s13, %s250_s23  ;;  %p256_p5 = scmp.lt.s32.totalorder %s250_s23, %s250_s23 }
   0xd   :  { %p257_p6 = por %p256_p5, %p255_p4 }
   0xf   :  { %p258_p7 = pnand %p257_p6, %p251_p3 }
  0x11   :  { %261 = shalt.err (!%p258_p7)
}
  0x12   :  { %20 = dma.hbm_to_vmem [thread:$0]  %s386_s0, 128, %s18_s13, [#allocation3]  }
  0x13   :  { %s262_s28 = scalar_lea.hbm %s387_s1, 2048 }
  0x14   :  { %p263_p8 = scmp.ne.s32.totalorder %s387_s1, %s262_s28  ;;  %p266_p9 = scmp.lt.u32.totalorder %s262_s28, %s387_s1 }
  0x16   :  { %p268_p10 = pnand %p266_p9, %p263_p8 }
  0x18   :  { %271 = shalt.err (!%p268_p10)
}
  0x19   :  { %s272_s6 = scalar_lea.vmem %s340_s15, 2048  ;;  %p277_p12 = scmp.lt.s32.totalorder %s340_s15, %s340_s15 }
  0x1a   :  { %p273_p11 = scmp.ne.s32.totalorder %s340_s15, %s272_s6  ;;  %p278_p13 = scmp.lt.s32.totalorder %s272_s6, %s272_s6 }
  0x1c   :  { %p279_p0 = por %p278_p13, %p277_p12 }
  0x1e   :  { %p280_p1 = pnand %p279_p0, %p273_p11 }
  0x20   :  { %283 = shalt.err (!%p280_p1)
}
  0x21   :  { %s314_s0 = smov 128   ;;  %s315_s7 = smov 8  }
  0x22   :  { %32 = dma.hbm_to_vmem [thread:$0]  %s387_s1, 2048, %s340_s15, [#allocation6], %s314_s0, %s314_s0, %s315_s7  }
  0x23   :  { %306 = dma.done.wait [#allocation3], 128  }
  0x24   :  { %307 = vsyncadd [#allocation3], 4294967168 }
  0x25   :  { %308 = dma.done.wait [#allocation6], 2048  }
  0x26   :  { %309 = vsyncadd [#allocation6], 4294965248  ;;  %v316_v0 = vmov 0.0|0.0   ;;  %vm317_vm0 = vmmov 0   ;;  %v318_v1 = vmov 0.0   ;;  %v42_v2 = vld [vmem:[#allocation5] sm:$0xff] }
  0x27   :  { %206 = vmatprep.subr.bf16.mxu0 %v316_v0  ;;  %203 = vmatprep.mubr.msk.f32.mxu0 %vm317_vm0, %v318_v1  ;;  %v43_v3 = vld [vmem:[#allocation5 + $0x8] sm:$0xff]  ;;  %v44_v5 = vld [vmem:[#allocation5 + $0x10] sm:$0xff]  ;;  %v45_v6 = vld [vmem:[#allocation5 + $0x18] sm:$0xff]  ;;  %s319_s11 = smov [#allocation7]  }
  0x28   :  { %v207_v4 = vpack.c.bf16 %v43_v3, %v42_v2  ;;  %v210_v7 = vpack.c.bf16 %v45_v6, %v44_v5  ;;  %v46_v8 = vld [vmem:[#allocation5 + $0x20] sm:$0xff]  ;;  %v47_v9 = vld [vmem:[#allocation5 + $0x28] sm:$0xff]  ;;  %v48_v11 = vld [vmem:[#allocation5 + $0x30] sm:$0xff]  ;;  %s143_s12 = sshll.u32 %s319_s11, 4  ;;  %s144_s12 = int_to_ptr.vmem [resolvable:$true] %s143_s12 }
  0x29   :  { %v213_v10 = vpack.c.bf16 %v47_v9, %v46_v8  ;;  %v49_v12 = vld [vmem:[#allocation5 + $0x38] sm:$0xff]  ;;  %v50_v14 = vld [vmem:[#allocation5 + $0x40] sm:$0xff]  ;;  %v51_v15 = vld [vmem:[#allocation5 + $0x48] sm:$0xff]  ;;  %s284_s13 = scalar_lea.vmem %s144_s12, 128  ;;  %p289_p3 = scmp.lt.s32.totalorder %s144_s12, %s144_s12 }
  0x2a   :  { %208 = vmatpush3.bf16.xpose.msra.mxu0 %v207_v4  ;;  %v216_v13 = vpack.c.bf16 %v49_v12, %v48_v11  ;;  %v219_v16 = vpack.c.bf16 %v51_v15, %v50_v14  ;;  %v52_v17 = vld [vmem:[#allocation5 + $0x50] sm:$0xff]  ;;  %v53_v18 = vld [vmem:[#allocation5 + $0x58] sm:$0xff]  ;;  %v54_v20 = vld [vmem:[#allocation5 + $0x60] sm:$0xff]  ;;  %p285_p2 = scmp.ne.s32.totalorder %s144_s12, %s284_s13  ;;  %p290_p4 = scmp.lt.s32.totalorder %s284_s13, %s284_s13 }
  0x2b   :  { %209 = vmatprep.subr.bf16.mxu0 %v316_v0  ;;  %v222_v19 = vpack.c.bf16 %v53_v18, %v52_v17  ;;  %v55_v21 = vld [vmem:[#allocation5 + $0x68] sm:$0xff]  ;;  %v56_v23 = vld [vmem:[#allocation5 + $0x70] sm:$0xff]  ;;  %v57_v24 = vld [vmem:[#allocation5 + $0x78] sm:$0xff] }
  0x2c   :  { %v225_v22 = vpack.c.bf16 %v55_v21, %v54_v20  ;;  %v228_v25 = vpack.c.bf16 %v57_v24, %v56_v23  ;;  %v41_v26 = vld [vmem:[#allocation2] sm:$0xff]  ;;  %p291_p5 = por %p290_p4, %p289_p3 }
  0x2d   :  { %v153_v27 = vld [vmem:[%s388_s2] ss:$0 sm:$0xff] }
  0x2e   :  { %p292_p6 = pnand %p291_p5, %p285_p2 }
  0x32   :  { %211 = vmatpush3.bf16.xpose.msra.mxu0 %v210_v7 }
  0x33   :  { %212 = vmatprep.subr.bf16.mxu0 %v316_v0 }
  0x3a   :  { %214 = vmatpush3.bf16.xpose.msra.mxu0 %v213_v10 }
  0x3b   :  { %215 = vmatprep.subr.bf16.mxu0 %v316_v0 }
  0x42   :  { %217 = vmatpush3.bf16.xpose.msra.mxu0 %v216_v13 }
  0x43   :  { %218 = vmatprep.subr.bf16.mxu0 %v316_v0 }
  0x4a   :  { %220 = vmatpush3.bf16.xpose.msra.mxu0 %v219_v16 }
  0x4b   :  { %221 = vmatprep.subr.bf16.mxu0 %v316_v0 }
  0x52   :  { %223 = vmatpush3.bf16.xpose.msra.mxu0 %v222_v19 }
  0x53   :  { %224 = vmatprep.subr.bf16.mxu0 %v316_v0 }
  0x5a   :  { %226 = vmatpush3.bf16.xpose.msra.mxu0 %v225_v22 }
  0x5b   :  { %227 = vmatprep.subr.bf16.mxu0 %v316_v0 }
  0x62   :  { %229 = vmatpush3.bf16.xpose.msra.mxu0 %v228_v25 }
  0x69   :  { %204 = vmatmul.mubr.f32.vlgmr.msra.gmra.mrb[0].mxu0 %v41_v26 }
 0x13c   :  { %v131_v28 = vpop.f32.mrb[0].mxu0 }
 0x13d   :  { %v132_v29 = vadd.f32 %v153_v27, %v131_v28  ;;  %v205_v30 = vpop.f32.mrb[1].mxu0 }
 0x13f   :  { %238 = vtanh.f32 %v132_v29 }
 0x149   :  { %v239_v31 = vpop.eup %238 }
 0x14a   :  { %136 = vst [vmem:[#allocation7] sm:$0xff] %v239_v31 }
 0x14b   :  { %295 = shalt.err (!%p292_p6)
}
 0x14c   :  { %s296_s2 = scalar_lea.hbm %s389_s3, 128 }
 0x14d   :  { %p297_p7 = scmp.ne.s32.totalorder %s389_s3, %s296_s2  ;;  %p300_p8 = scmp.lt.u32.totalorder %s296_s2, %s389_s3 }
 0x14f   :  { %p302_p9 = pnand %p300_p8, %p297_p7 }
 0x151   :  { %305 = shalt.err (!%p302_p9)
}
 0x152   :  { %146 = dma.vmem_to_hbm [thread:$0]  %s144_s12, 128, %s389_s3, [#allocation4]  }
 0x153   :  { %310 = dma.done.wait [#allocation4], 128  }
 0x154   :  { %311 = vsyncadd [#allocation4], 4294967168 }
 0x155   :  { %150 = vsyncpa [#allocation3], 1 }
 0x156   :  { %151 = vsyncpa [#allocation6], 1 }
 0x157   :  { %152 = vsyncpa [#allocation4], 1 }

</bundles_post_ra>
